<compile_context>
chip_gen: v6e
topology: v6e:2x2x1
jax: 0.10.0
libtpu: 0.0.40
codegen_flags: <defaults>
</compile_context>

<pallas_src>
import math

import jax
import jax.numpy as jnp
from jax.experimental import pallas as pl
from jax.experimental.pallas import tpu as pltpu


_GOLDEN = 0x9E3779B9  # 32-bit golden-ratio constant for seed mixing.


def _hash_u32(x):
    """Murmur3-style 32-bit finalizer (good avalanche, counter-based PRNG)."""
    x = x ^ (x >> 16)
    x = x * jnp.uint32(0x7FEB352D)
    x = x ^ (x >> 15)
    x = x * jnp.uint32(0x846CA68B)
    x = x ^ (x >> 16)
    return x


def _bits_to_unit_float(bits):
    """Top 23 random bits -> f32 in [1, 2) via exponent bitcast (no converts)."""
    mant = jnp.uint32(0x3F800000) | (bits >> 9)
    return jax.lax.bitcast_convert_type(mant, jnp.float32)


def _gaus_noiser_kernel(seed_ref, basep_ref, x_ref, o_ref):
    """seed_ref/basep_ref: SMEM scalar prefetch; x_ref/o_ref: VMEM tiles."""
    tm, w = x_ref.shape
    wh = w // 2  # one (u1, u2) pair produces two outputs (cos & sin branches)

    # Global pair counter: unique across the whole tensor and across tiles.
    row_ids = jax.lax.broadcasted_iota(jnp.int32, (tm, wh), 0)
    col_ids = jax.lax.broadcasted_iota(jnp.int32, (tm, wh), 1)
    local_pair = row_ids * wh + col_ids
    gpair = pl.program_id(0) * (tm * wh) + local_pair
    gpair_u = gpair.astype(jnp.uint32)

    key = seed_ref[0].astype(jnp.uint32) * jnp.uint32(_GOLDEN)

    # Two independent 32-bit draws per pair (distinct counters, keyed by seed).
    b1 = _hash_u32((gpair_u << 1) ^ key)
    b2 = _hash_u32(((gpair_u << 1) | jnp.uint32(1)) ^ key)

    f1 = _bits_to_unit_float(b1)            # [1, 2)
    f2 = _bits_to_unit_float(b2)            # [1, 2)
    u1 = jnp.float32(2.0) - f1              # (0, 1]  -> log() is finite
    u2 = f2 - jnp.float32(1.0)              # [0, 1)

    r = jnp.sqrt(jnp.float32(-2.0) * jnp.log(u1))
    theta = jnp.float32(2.0 * math.pi) * u2
    z1 = r * jnp.cos(theta)
    z2 = r * jnp.sin(theta)
    z = jnp.concatenate([z1, z2], axis=-1)  # (tm, w), lane dims are 128-aligned

    base_p = basep_ref[0]
    xf = x_ref[...].astype(jnp.float32)
    o_ref[...] = (xf + z * base_p).astype(o_ref.dtype)


def gaus_noiser(x, power, seed, training=True):
    """JAX/Pallas equivalent of GausNoiser(power).forward(x), mask=None path."""
    if not training:
        return x

    orig_shape = x.shape
    orig_dtype = x.dtype
    n = x.size

    # Hoisted global reduction (XLA): base_p = mean(|x|) * power.
    base_p = (jnp.mean(jnp.abs(x.astype(jnp.float32))) * jnp.float32(power)).reshape(1)

    # Lane-dense slab: (rows, 512); tile along rows only (contiguous DMA blocks).
    W = 512
    rows = pl.cdiv(n, W)
    if rows <= 256:
        tm = rows                      # single block == full extent (no 8-div need)
    else:
        tm = 256                       # ~512 KiB f32 tiles, multiple of 8
        rows = pl.cdiv(rows, tm) * tm
    n_pad = rows * W

    xf = x.reshape(-1)
    if n_pad != n:
        xf = jnp.pad(xf, (0, n_pad - n))
    x2d = xf.reshape(rows, W)

    seed_arr = jnp.asarray([seed], dtype=jnp.int32)

    out2d = pl.pallas_call(
        _gaus_noiser_kernel,
        out_shape=jax.ShapeDtypeStruct((rows, W), orig_dtype),
        grid_spec=pltpu.PrefetchScalarGridSpec(
            num_scalar_prefetch=2,
            grid=(rows // tm,),
            in_specs=[pl.BlockSpec((tm, W), lambda i, *_: (i, 0))],
            out_specs=pl.BlockSpec((tm, W), lambda i, *_: (i, 0)),
        ),
        compiler_params=pltpu.CompilerParams(
            dimension_semantics=("parallel",),   # megacore sharding on v7x
            vmem_limit_bytes=32 * 1024 * 1024,
        ),
    )(seed_arr, base_p, x2d)

    out = out2d.reshape(-1)
    if n_pad != n:
        out = out[:n]
    return out.reshape(orig_shape)


if __name__ == "__main__":
    key = jax.random.PRNGKey(0)
    # NCHW input, as the PyTorch module would typically see.
    x = jax.random.normal(key, (2, 4, 16, 16), dtype=jnp.float32)

    power = 0.1
    out = gaus_noiser(x, power=power, seed=0, training=True)
    out = jax.block_until_ready(out)

    # Sanity checks: shape/dtype preserved; injected noise has std ~= base_p.
    assert out.shape == x.shape and out.dtype == x.dtype
    base_p = float(jnp.mean(jnp.abs(x)) * power)
    noise = out - x
    assert bool(jnp.all(jnp.isfinite(noise)))
    noise_std = float(jnp.std(noise))
    assert abs(noise_std - base_p) / base_p < 0.25, (noise_std, base_p)
    noise_mean = float(jnp.mean(noise))
    assert abs(noise_mean) < 0.25 * base_p, (noise_mean, base_p)

    # Eval mode is identity.
    out_eval = gaus_noiser(x, power=power, seed=0, training=False)
    assert bool(jnp.all(out_eval == x))

    print("KERNEL_OK")
</pallas_src>

<mosaic_0001>
module attributes {stable_mosaic.version = 11 : i64} {
  func.func @_gaus_noiser_kernel(%arg0: i32, %arg1: memref<1xi32, #tpu.memory_space<smem>>, %arg2: memref<1xf32, #tpu.memory_space<smem>>, %arg3: memref<4x512xf32, #tpu.memory_space<vmem>>, %arg4: memref<4x512xf32, #tpu.memory_space<vmem>>) attributes {dimension_semantics = [#tpu.dimension_semantics<parallel>], iteration_bounds = array<i64: 1>, scalar_prefetch = 2 : i64, scratch_operands = 0 : i64, tpu.core_type = #tpu.core_type<tc>, window_params = [{transform_indices = @transform_0, window_bounds = array<i64: 4, 512>}, {transform_indices = @transform_1, window_bounds = array<i64: 4, 512>}]} {
    %0 = tpu.iota {dimensions = array<i32: 0>} : vector<4x256xi32>
    %1 = tpu.iota {dimensions = array<i32: 1>} : vector<4x256xi32>
    %c256_i32 = arith.constant 256 : i32
    %2 = vector.broadcast %c256_i32 : i32 to vector<4x256xi32>
    %3 = arith.muli %0, %2 : vector<4x256xi32>
    %4 = arith.addi %3, %1 : vector<4x256xi32>
    %c1024_i32 = arith.constant 1024 : i32
    %5 = arith.muli %arg0, %c1024_i32 : i32
    %6 = vector.broadcast %5 : i32 to vector<4x256xi32>
    %7 = arith.addi %6, %4 : vector<4x256xi32>
    %c0 = arith.constant 0 : index
    %8 = memref.load %arg1[%c0] : memref<1xi32, #tpu.memory_space<smem>>
    %c-1640531527_i32 = arith.constant -1640531527 : i32
    %9 = arith.muli %8, %c-1640531527_i32 : i32
    %c1_i32 = arith.constant 1 : i32
    %10 = vector.broadcast %c1_i32 : i32 to vector<4x256xi32>
    %11 = arith.shli %7, %10 : vector<4x256xi32>
    %12 = vector.broadcast %9 : i32 to vector<4x256xi32>
    %13 = arith.xori %11, %12 : vector<4x256xi32>
    %c16_i32 = arith.constant 16 : i32
    %14 = vector.broadcast %c16_i32 : i32 to vector<4x256xi32>
    %15 = arith.shrui %13, %14 : vector<4x256xi32>
    %16 = arith.xori %13, %15 : vector<4x256xi32>
    %c2146121005_i32 = arith.constant 2146121005 : i32
    %17 = vector.broadcast %c2146121005_i32 : i32 to vector<4x256xi32>
    %18 = arith.muli %16, %17 : vector<4x256xi32>
    %c15_i32 = arith.constant 15 : i32
    %19 = vector.broadcast %c15_i32 : i32 to vector<4x256xi32>
    %20 = arith.shrui %18, %19 : vector<4x256xi32>
    %21 = arith.xori %18, %20 : vector<4x256xi32>
    %c-2073254261_i32 = arith.constant -2073254261 : i32
    %22 = vector.broadcast %c-2073254261_i32 : i32 to vector<4x256xi32>
    %23 = arith.muli %21, %22 : vector<4x256xi32>
    %c16_i32_0 = arith.constant 16 : i32
    %24 = vector.broadcast %c16_i32_0 : i32 to vector<4x256xi32>
    %25 = arith.shrui %23, %24 : vector<4x256xi32>
    %26 = arith.xori %23, %25 : vector<4x256xi32>
    %c1_i32_1 = arith.constant 1 : i32
    %27 = vector.broadcast %c1_i32_1 : i32 to vector<4x256xi32>
    %28 = arith.shli %7, %27 : vector<4x256xi32>
    %c1_i32_2 = arith.constant 1 : i32
    %29 = vector.broadcast %c1_i32_2 : i32 to vector<4x256xi32>
    %30 = arith.ori %28, %29 : vector<4x256xi32>
    %31 = vector.broadcast %9 : i32 to vector<4x256xi32>
    %32 = arith.xori %30, %31 : vector<4x256xi32>
    %c16_i32_3 = arith.constant 16 : i32
    %33 = vector.broadcast %c16_i32_3 : i32 to vector<4x256xi32>
    %34 = arith.shrui %32, %33 : vector<4x256xi32>
    %35 = arith.xori %32, %34 : vector<4x256xi32>
    %c2146121005_i32_4 = arith.constant 2146121005 : i32
    %36 = vector.broadcast %c2146121005_i32_4 : i32 to vector<4x256xi32>
    %37 = arith.muli %35, %36 : vector<4x256xi32>
    %c15_i32_5 = arith.constant 15 : i32
    %38 = vector.broadcast %c15_i32_5 : i32 to vector<4x256xi32>
    %39 = arith.shrui %37, %38 : vector<4x256xi32>
    %40 = arith.xori %37, %39 : vector<4x256xi32>
    %c-2073254261_i32_6 = arith.constant -2073254261 : i32
    %41 = vector.broadcast %c-2073254261_i32_6 : i32 to vector<4x256xi32>
    %42 = arith.muli %40, %41 : vector<4x256xi32>
    %c16_i32_7 = arith.constant 16 : i32
    %43 = vector.broadcast %c16_i32_7 : i32 to vector<4x256xi32>
    %44 = arith.shrui %42, %43 : vector<4x256xi32>
    %45 = arith.xori %42, %44 : vector<4x256xi32>
    %c9_i32 = arith.constant 9 : i32
    %46 = vector.broadcast %c9_i32 : i32 to vector<4x256xi32>
    %47 = arith.shrui %26, %46 : vector<4x256xi32>
    %c1065353216_i32 = arith.constant 1065353216 : i32
    %48 = vector.broadcast %c1065353216_i32 : i32 to vector<4x256xi32>
    %49 = arith.ori %48, %47 : vector<4x256xi32>
    %50 = tpu.bitcast %49 : vector<4x256xi32> -> vector<4x256xf32>
    %c9_i32_8 = arith.constant 9 : i32
    %51 = vector.broadcast %c9_i32_8 : i32 to vector<4x256xi32>
    %52 = arith.shrui %45, %51 : vector<4x256xi32>
    %c1065353216_i32_9 = arith.constant 1065353216 : i32
    %53 = vector.broadcast %c1065353216_i32_9 : i32 to vector<4x256xi32>
    %54 = arith.ori %53, %52 : vector<4x256xi32>
    %55 = tpu.bitcast %54 : vector<4x256xi32> -> vector<4x256xf32>
    %cst = arith.constant 2.000000e+00 : f32
    %56 = vector.broadcast %cst : f32 to vector<4x256xf32>
    %57 = arith.subf %56, %50 : vector<4x256xf32>
    %cst_10 = arith.constant 1.000000e+00 : f32
    %58 = vector.broadcast %cst_10 : f32 to vector<4x256xf32>
    %59 = arith.subf %55, %58 : vector<4x256xf32>
    %60 = math.log %57 : vector<4x256xf32>
    %cst_11 = arith.constant -2.000000e+00 : f32
    %61 = vector.broadcast %cst_11 : f32 to vector<4x256xf32>
    %62 = arith.mulf %61, %60 : vector<4x256xf32>
    %63 = math.sqrt %62 : vector<4x256xf32>
    %cst_12 = arith.constant 6.28318548 : f32
    %64 = vector.broadcast %cst_12 : f32 to vector<4x256xf32>
    %65 = arith.mulf %64, %59 : vector<4x256xf32>
    %66 = math.cos %65 : vector<4x256xf32>
    %67 = arith.mulf %63, %66 : vector<4x256xf32>
    %68 = math.sin %65 : vector<4x256xf32>
    %69 = arith.mulf %63, %68 : vector<4x256xf32>
    %70 = tpu.concatenate %67, %69 in 1 : vector<4x256xf32>, vector<4x256xf32> -> vector<4x512xf32>
    %c0_13 = arith.constant 0 : index
    %71 = memref.load %arg2[%c0_13] : memref<1xf32, #tpu.memory_space<smem>>
    %c0_14 = arith.constant 0 : index
    %c0_15 = arith.constant 0 : index
    %72 = vector.load %arg3[%c0_14, %c0_15] : memref<4x512xf32, #tpu.memory_space<vmem>>, vector<4x512xf32>
    %73 = vector.broadcast %71 : f32 to vector<4x512xf32>
    %74 = arith.mulf %70, %73 : vector<4x512xf32>
    %75 = arith.addf %72, %74 : vector<4x512xf32>
    %c0_16 = arith.constant 0 : index
    %c0_17 = arith.constant 0 : index
    %76 = vector.load %arg4[%c0_16, %c0_17] : memref<4x512xf32, #tpu.memory_space<vmem>>, vector<4x512xf32>
    tpu.vector_store %arg4[%c0_16, %c0_17], %75 {strides = array<i32>} : memref<4x512xf32, #tpu.memory_space<vmem>>, vector<4x512xf32>,
    return
  }
  func.func @transform_0(%arg0: i32, %arg1: memref<1xi32, #tpu.memory_space<smem>>, %arg2: memref<1xf32, #tpu.memory_space<smem>>) -> (i32, i32) {
    %c0_i32 = arith.constant 0 : i32
    %c0_i32_0 = arith.constant 0 : i32
    return %arg0, %c0_i32 : i32, i32
  }
  func.func @transform_1(%arg0: i32, %arg1: memref<1xi32, #tpu.memory_space<smem>>, %arg2: memref<1xf32, #tpu.memory_space<smem>>) -> (i32, i32) {
    %c0_i32 = arith.constant 0 : i32
    %c0_i32_0 = arith.constant 0 : i32
    return %arg0, %c0_i32 : i32, i32
  }
}

</mosaic_0001>

<bundles_post_ra>
// kernel: tpu_custom_call.1
= control target key start
LH: loop header
LB: loop body
LE: loop exit
PB: predicated region body
PF: predicated region fallthrough
CT: control target
= control target key end

     0   :  { %10 = vsyncpa [#allocation6], 0  ;;  %s820_s0 = inlined_call_operand.<no memory space> [shape: s32[1], index: 0, kind: input, shape index: {}]   ;;  %s821_s1 = inlined_call_operand.<no memory space> [shape: f32[1], index: 1, kind: input, shape index: {}]   ;;  %s822_s2 = inlined_call_operand.hbm [shape: f32[4,512], index: 2, kind: input, shape index: {}]   ;;  %s823_s3 = inlined_call_operand.hbm [shape: f32[4,512], index: 3, kind: output, shape index: {}]  }
   0x1   :  { %11 = vsyncpa [#allocation7], 0  ;;  %s665_s12 = smov [#allocation5]  }
   0x2   :  { %s18_s13 = sshll.u32 %s665_s12, 4  ;;  %s19_s13 = int_to_ptr.vmem [resolvable:$true] %s18_s13 }
   0x3   :  { %s629_s14 = scalar_lea.vmem %s19_s13, 256  ;;  %p634_p1 = scmp.lt.s32.totalorder %s19_s13, %s19_s13 }
   0x4   :  { %p630_p0 = scmp.ne.s32.totalorder %s19_s13, %s629_s14  ;;  %p635_p2 = scmp.lt.s32.totalorder %s629_s14, %s629_s14 }
   0x6   :  { %p636_p3 = por %p635_p2, %p634_p1 }
   0x8   :  { %p637_p4 = pnand %p636_p3, %p630_p0 }
   0xa   :  { %640 = shalt.err (!%p637_p4)
}
   0xb   :  { %21 = dma.hbm_to_vmem [thread:$0]  %s822_s2, 256, %s19_s13, [#allocation6]  }
   0xc   :  { %661 = dma.done.wait [#allocation6], 256  }
   0xd   :  { %662 = vsyncadd [#allocation6], 4294967040  ;;  %v25_v0 = vlaneseq  ;;  %s38_s19 = smul.u32 2654435769, %s820_s0  ;;  %s672_s20 = smov [#allocation8]  }
   0xe   :  { %s562_s21 = sshll.u32 %s672_s20, 4  ;;  %s563_s21 = int_to_ptr.vmem [resolvable:$true] %s562_s21 }
   0xf   :  { %v26_v1 = vshrl.u32 %v25_v0, 7  ;;  %v28_v2 = vand.u32 127, %v25_v0  ;;  %v41_v9 = vstv %s38_s19  ;;  %p646_p6 = scmp.lt.s32.totalorder %s563_s21, %s563_s21 }
  0x11   :  { %v29_v3 = vadd.s32 128, %v28_v2  ;;  %v30_v4 = vmul.u32 256, %v26_v1 }
  0x13   :  { %v31_v5 = vadd.s32 %v30_v4, %v28_v2  ;;  %v32_v6 = vadd.s32 %v30_v4, %v29_v3 }
  0x15   :  { %v39_v7 = vshll.u32 %v31_v5, 1  ;;  %v40_v8 = vshll.u32 %v32_v6, 1  ;;  %v666_v5 = vmov 683565275  }
  0x17   :  { %v60_v10 = vor.u32 1, %v39_v7  ;;  %v61_v11 = vor.u32 1, %v40_v8  ;;  %v42_v24 = vxor.u32 %v41_v9, %v39_v7  ;;  %v43_v29 = vxor.u32 %v41_v9, %v40_v8 }
  0x18   :  { %v667_v7 = vmov 2475754826  }
  0x19   :  { %v62_v12 = vxor.u32 %v60_v10, %v41_v9  ;;  %v63_v13 = vxor.u32 %v61_v11, %v41_v9  ;;  %v44_v30 = vshrl.u32 %v42_v24, 16  ;;  %v45_v35 = vshrl.u32 %v43_v29, 16 }
  0x1a   :  { %v668_v9 = vmov 2131351028  }
  0x1b   :  { %v64_v14 = vshrl.u32 %v62_v12, 16  ;;  %v65_v15 = vshrl.u32 %v63_v13, 16  ;;  %v46_v36 = vxor.u32 %v44_v30, %v42_v24  ;;  %v47_v41 = vxor.u32 %v45_v35, %v43_v29 }
  0x1d   :  { %v66_v16 = vxor.u32 %v64_v14, %v62_v12  ;;  %v67_v17 = vxor.u32 %v65_v15, %v63_v13  ;;  %v48_v42 = vmul.u32 2146121005, %v46_v36  ;;  %v49_v46 = vmul.u32 2146121005, %v47_v41 }
  0x1e   :  { %v669_v12 = vmov 2102212464   ;;  %v670_v14 = vmov 920167782  }
  0x1f   :  { %v68_v18 = vmul.u32 2146121005, %v66_v16  ;;  %v69_v19 = vmul.u32 2146121005, %v67_v17  ;;  %v50_v47 = vshrl.u32 %v48_v42, 15  ;;  %v51_v53 = vshrl.u32 %v49_v46, 15 }
  0x21   :  { %v70_v20 = vshrl.u32 %v68_v18, 15  ;;  %v71_v21 = vshrl.u32 %v69_v19, 15  ;;  %v706_v54 = vxor.u32 %v50_v47, %v48_v42  ;;  %v710_v59 = vxor.u32 %v51_v53, %v49_v46 }
  0x23   :  { %v72_v22 = vxor.u32 %v70_v20, %v68_v18  ;;  %v73_v23 = vxor.u32 %v71_v21, %v69_v19  ;;  %v54_v60 = vmul.u32 2221713035, %v706_v54  ;;  %v55_v2 = vmul.u32 2221713035, %v710_v59 }
  0x25   :  { %v74_v25 = vmul.u32 2221713035, %v72_v22  ;;  %v75_v26 = vmul.u32 2221713035, %v73_v23  ;;  %v56_v3 = vshrl.u32 %v54_v60, 16  ;;  %v57_v35 = vshrl.u32 %v55_v2, 16 }
  0x26   :  { %v671_v23 = vmov 1326507024  }
  0x27   :  { %v76_v27 = vshrl.u32 %v74_v25, 16  ;;  %v77_v28 = vshrl.u32 %v75_v26, 16 }
  0x29   :  { %v78_v31 = vxor.u32 %v76_v27, %v74_v25  ;;  %v79_v32 = vxor.u32 %v77_v28, %v75_v26 }
  0x2b   :  { %v86_v33 = vshrl.u32 %v78_v31, 9  ;;  %v87_v34 = vshrl.u32 %v79_v32, 9 }
  0x2d   :  { %v88_v37 = vor.u32 1065353216, %v86_v33  ;;  %v89_v38 = vor.u32 1065353216, %v87_v34 }
  0x2f   :  { %v571_v39 = vadd.f32 -1.0, %v88_v37  ;;  %v572_v40 = vadd.f32 -1.0, %v89_v38 }
  0x31   :  { %v699_v43 = vmul.f32 6.2831855, %v571_v39  ;;  %v701_v44 = vmul.f32 6.2831855, %v572_v40 }
  0x33   :  { %v121_v45 = vand.u32 2139095040, %v699_v43  ;;  %v224_v48 = vand.u32 2139095040, %v701_v44  ;;  %v118_v50 = vand.u32 2147483647, %v699_v43  ;;  %v221_v11 = vand.u32 2147483647, %v701_v44 }
  0x34   :  { %vm120_vm13 = vcmp.lt.s32.totalorder %v699_v43, 0 }
  0x35   :  { %v122_v49 = vshrl.u32 %v121_v45, 23  ;;  %v225_v51 = vshrl.u32 %v224_v48, 23  ;;  %v125_v57 = vand.u32 8388607, %v118_v50  ;;  %v228_v42 = vand.u32 8388607, %v221_v11 }
  0x36   :  { %vm775_vm15 = vcmp.le.f32.partialorder %v118_v50, 0.7853982 }
  0x37   :  { %v573_v52 = vadd.s32 4294967169, %v122_v49  ;;  %v577_v55 = vadd.s32 4294967169, %v225_v51  ;;  %v126_v63 = vor.u32 8388608, %v125_v57 }
  0x39   :  { %v128_v56 = vadd.s32 1, %v573_v52  ;;  %v231_v58 = vadd.s32 1, %v577_v55  ;;  %v718_v16 = vshll.u32 %v126_v63, 8 }
  0x3b   :  { %vm129_vm0 = vcmp.gt.s32.totalorder %v128_v56, 0  ;;  %vm232_vm1 = vcmp.gt.s32.totalorder %v231_v58, 0 }
  0x3c   :  { %v130_v61 = vsel %vm129_vm0, %v128_v56, 0  ;;  %v233_v1 = vsel %vm232_vm1, %v231_v58, 0  ;;  %vm223_vm0 = vcmp.lt.s32.totalorder %v701_v44, 0  ;;  %vm222_vm1 = vcmp.le.f32.partialorder %v221_v11, 0.7853982 }
  0x3d   :  { %v132_v62 = vand.u32 31, %v130_v61  ;;  %v131_v4 = vshrl.u32 %v130_v61, 5  ;;  %v235_v17 = vand.u32 31, %v233_v1  ;;  %v234_v55 = vshrl.u32 %v233_v1, 5 }
  0x3f   :  { %v133_v0 = vsub.s32 32, %v132_v62  ;;  %v135_v6 = vshll.u32 %v666_v5, %v132_v62  ;;  %v138_v8 = vshll.u32 %v667_v7, %v132_v62  ;;  %v141_v10 = vshll.u32 %v668_v9, %v132_v62 }
  0x40   :  { %v144_v13 = vshll.u32 %v669_v12, %v132_v62  ;;  %v147_v15 = vshll.u32 %v670_v14, %v132_v62  ;;  %vm150_vm2 = vcmp.lt.s32.totalorder %v131_v4, 1  ;;  %vm151_vm3 = vcmp.lt.s32.totalorder %v131_v4, 2 }
  0x41   :  { %v134_v18 = vshrl.u32 %v666_v5, %v133_v0  ;;  %v136_v19 = vshrl.u32 %v667_v7, %v133_v0  ;;  %v139_v20 = vshrl.u32 %v668_v9, %v133_v0  ;;  %v142_v21 = vshrl.u32 %v669_v12, %v133_v0 }
  0x42   :  { %v145_v22 = vshrl.u32 %v670_v14, %v133_v0  ;;  %v148_v24 = vshrl.u32 %v671_v23, %v133_v0  ;;  %vm152_vm4 = vcmp.lt.s32.totalorder %v131_v4, 3  ;;  %vm153_vm5 = vcmp.lt.s32.totalorder %v131_v4, 4 }
  0x43   :  { %v137_v25 = vor.u32 %v136_v19, %v135_v6  ;;  %v140_v26 = vor.u32 %v139_v20, %v138_v8  ;;  %v143_v27 = vor.u32 %v142_v21, %v141_v10  ;;  %v236_v30 = vsub.s32 32, %v235_v17 }
  0x44   :  { %v146_v28 = vor.u32 %v145_v22, %v144_v13  ;;  %v149_v29 = vor.u32 %v148_v24, %v147_v15  ;;  %v238_v47 = vshll.u32 %v666_v5, %v235_v17  ;;  %v241_v56 = vshll.u32 %v667_v7, %v235_v17 }
  0x45   :  { %v154_v31 = vsel %vm150_vm2, %v134_v18, %v137_v25  ;;  %v155_v32 = vsel %vm153_vm5, %v143_v27, 2102212464  ;;  %v158_v33 = vsel %vm150_vm2, %v137_v25, %v140_v26  ;;  %v162_v34 = vsel %vm150_vm2, %v140_v26, %v143_v27 }
  0x46   :  { %v156_v36 = vsel %vm152_vm4, %v140_v26, %v155_v32  ;;  %v159_v37 = vsel %vm153_vm5, %v146_v28, 920167782  ;;  %v163_v38 = vsel %vm153_vm5, %v149_v29, 1326507024  ;;  %v239_v48 = vshrl.u32 %v667_v7, %v236_v30 }
  0x47   :  { %v157_v39 = vsel %vm151_vm3, %v154_v31, %v156_v36  ;;  %v160_v40 = vsel %vm152_vm4, %v143_v27, %v159_v37  ;;  %v164_v41 = vsel %vm152_vm4, %v146_v28, %v163_v38  ;;  %v242_v57 = vshrl.u32 %v668_v9, %v236_v30 }
  0x48   :  { %v161_v45 = vsel %vm151_vm3, %v158_v33, %v160_v40  ;;  %v165_v46 = vsel %vm151_vm3, %v162_v34, %v164_v41  ;;  %v244_v58 = vshll.u32 %v668_v9, %v235_v17  ;;  %v245_v61 = vshrl.u32 %v669_v12, %v236_v30 }
  0x49   :  { %v730_v49 = vmul.u32.u64.low %v718_v16, %v165_v46  ;;  %v731_v51 = vmul.u32.u64.high %v718_v16, %v165_v46, %v730_v49  ;;  %v734_v52 = vmul.u32.u64.low %v718_v16, %v161_v45  ;;  %v735_v53 = vmul.u32.u64.high %v718_v16, %v161_v45, %v734_v52 }
  0x4a   :  { %v247_v62 = vshll.u32 %v669_v12, %v235_v17  ;;  %v248_v63 = vshrl.u32 %v670_v14, %v236_v30  ;;  %v250_v0 = vshll.u32 %v670_v14, %v235_v17  ;;  %v58_v4 = vxor.u32 %v56_v3, %v54_v60 }
  0x4b   :  { %v173_v6 = vmul.u32 %v718_v16, %v157_v39  ;;  %v229_v8 = vor.u32 8388608, %v228_v42  ;;  %v251_v10 = vshrl.u32 %v671_v23, %v236_v30  ;;  %vm175_vm6 = vc.u32 %v731_v51, %v734_v52 }
  0x4c   :  { %v176_v13 = vadd.s32 1, %v735_v53  ;;  %v240_v1 = vor.u32 %v239_v48, %v238_v47  ;;  %v243_v7 = vor.u32 %v242_v57, %v241_v56  ;;  %v237_v9 = vshrl.u32 %v666_v5, %v236_v30 }
  0x4d   :  { %v246_v15 = vor.u32 %v245_v61, %v244_v58  ;;  %v249_v12 = vor.u32 %v248_v63, %v247_v62  ;;  %vm253_vm7 = vcmp.lt.s32.totalorder %v234_v55, 1  ;;  %v252_v54 = vor.u32 %v251_v10, %v250_v0 }
  0x4e   :  { %v177_v14 = vsel %vm175_vm6, %v176_v13, %v735_v53  ;;  %vm255_vm8 = vcmp.lt.s32.totalorder %v234_v55, 3  ;;  %vm256_vm9 = vcmp.lt.s32.totalorder %v234_v55, 4  ;;  %v59_v60 = vxor.u32 %v57_v35, %v55_v2 }
  0x4f   :  { %v178_v3 = vadd.s32 %v177_v14, %v173_v6  ;;  %vm254_vm10 = vcmp.lt.s32.totalorder %v234_v55, 2  ;;  %v269_v16 = vshll.u32 %v229_v8, 8  ;;  %v80_v17 = vshrl.u32 %v58_v4, 9 }
  0x50   :  { %v258_v18 = vsel %vm256_vm9, %v246_v15, 2102212464  ;;  %v261_v19 = vsel %vm253_vm7, %v240_v1, %v243_v7  ;;  %v262_v20 = vsel %vm256_vm9, %v249_v12, 920167782  ;;  %v265_v22 = vsel %vm253_vm7, %v243_v7, %v246_v15 }
  0x51   :  { %v179_v5 = vadd.s32 536870912, %v178_v3  ;;  %v263_v21 = vsel %vm255_vm8, %v246_v15, %v262_v20  ;;  %v257_v23 = vsel %vm253_vm7, %v237_v9, %v240_v1  ;;  %v259_v24 = vsel %vm255_vm8, %v243_v7, %v258_v18 }
  0x52   :  { %v264_v59 = vsel %vm254_vm10, %v261_v19, %v263_v21  ;;  %v266_v2 = vsel %vm256_vm9, %v252_v54, 1326507024  ;;  %v81_v29 = vshrl.u32 %v59_v60, 9  ;;  %v82_v30 = vor.u32 1065353216, %v80_v17 }
  0x53   :  { %v754_v25 = vshrl.u32 %v179_v5, 30  ;;  %v267_v26 = vsel %vm255_vm8, %v249_v12, %v266_v2  ;;  %v757_v27 = vmul.u32.u64.low %v269_v16, %v264_v59  ;;  %v758_v28 = vmul.u32.u64.high %v269_v16, %v264_v59, %v757_v27 }
  0x54   :  { %v268_v31 = vsel %vm254_vm10, %v265_v22, %v267_v26  ;;  %v260_v33 = vsel %vm254_vm10, %v257_v23, %v259_v24  ;;  %v83_v39 = vor.u32 1065353216, %v81_v29  ;;  %v92_v40 = vsub.f32 2.0, %v82_v30 }
  0x55   :  { %v181_v32 = vshll.u32 %v754_v25, 30  ;;  %v763_v34 = vmul.u32.u64.low %v269_v16, %v268_v31  ;;  %v764_v35 = vmul.u32.u64.high %v269_v16, %v268_v31, %v763_v34  ;;  %v279_v37 = vadd.s32 1, %v758_v28 }
  0x56   :  { %v276_v38 = vmul.u32 %v269_v16, %v260_v33  ;;  %v93_v47 = vsub.f32 2.0, %v83_v39  ;;  %605 = vlog2.f32 %v92_v40  ;;  %v174_v56 = vadd.s32 %v734_v52, %v731_v51 }
  0x57   :  { %v182_v36 = vsub.s32 %v178_v3, %v181_v32  ;;  %vm278_vm11 = vc.u32 %v764_v35, %v757_v27  ;;  %v277_v3 = vadd.s32 %v757_v27, %v764_v35  ;;  %v204_v24 = vsub.s32 4, %v754_v25 }
  0x58   :  { %v280_v42 = vsel %vm278_vm11, %v279_v37, %v758_v28  ;;  %607 = vlog2.f32 %v93_v47  ;;  %vm210_vm10 = vweird.f32 %v699_v43 }
  0x59   :  { %v184_v41 = vsub.s32 0, %v182_v36  ;;  %v281_v46 = vadd.s32 %v280_v42, %v276_v38  ;;  %v205_v29 = vsel %vm120_vm13, %v204_v24, %v754_v25 }
  0x5a   :  { %v207_v33 = vsel %vm775_vm15, 0, %v205_v29 }
  0x5b   :  { %v574_v45 = vmin.u32 %v184_v41, %v182_v36  ;;  %v282_v49 = vadd.s32 536870912, %v281_v46  ;;  %v419_v37 = vadd.s32 3, %v207_v33  ;;  %v211_v41 = vand.u32 3, %v207_v33 }
  0x5d   :  { %v186_v48 = vclz %v574_v45  ;;  %v283_v55 = vshrl.u32 %v282_v49, 30  ;;  %v420_v42 = vand.u32 3, %v419_v37  ;;  %vm213_vm2 = vcmp.eq.s32.totalorder %v211_v41, 0 }
  0x5e   :  { %vm216_vm3 = vcmp.eq.s32.totalorder %v211_v41, 2  ;;  %vm212_vm7 = vcmp.lt.s32.totalorder %v211_v41, 2 }
  0x5f   :  { %v575_v53 = vadd.s32 4294967294, %v186_v48  ;;  %v284_v58 = vshll.u32 %v283_v55, 30  ;;  %v307_v35 = vsub.s32 4, %v283_v55  ;;  %vm422_vm4 = vcmp.eq.s32.totalorder %v420_v42, 0 }
  0x60   :  { %vm425_vm5 = vcmp.eq.s32.totalorder %v420_v42, 2  ;;  %vm421_vm8 = vcmp.lt.s32.totalorder %v420_v42, 2 }
  0x61   :  { %vm576_vm12 = vcmp.lt.s32.totalorder %v575_v53, 0  ;;  %v285_v0 = vsub.s32 %v281_v46, %v284_v58  ;;  %v308_v39 = vsel %vm223_vm0, %v307_v35, %v283_v55 }
  0x62   :  { %v189_v57 = vsel %vm576_vm12, 0, %v575_v53  ;;  %v310_v47 = vsel %vm222_vm1, 0, %v308_v39 }
  0x63   :  { %v190_v61 = vsub.s32 32, %v189_v57  ;;  %v191_v62 = vshll.u32 %v182_v36, %v189_v57  ;;  %v194_v63 = vsub.s32 4294967266, %v189_v57  ;;  %v287_v8 = vsub.s32 0, %v285_v0  ;;  %v606_v15 = vpop.eup %605 }
  0x64   :  { %v97_v51 = vmul.f32 0.6931472, %v606_v15  ;;  %v523_v53 = vadd.s32 3, %v310_v47 }
  0x65   :  { %v192_v4 = vshrl.u32 %v174_v56, %v190_v61  ;;  %v195_v6 = vadd.s32 127, %v194_v63  ;;  %v578_v1 = vmin.u32 %v287_v8, %v285_v0  ;;  %v608_v60 = vpop.eup %607 }
  0x66   :  { %v99_v21 = vmul.f32 0.6931472, %v608_v60  ;;  %v779_v22 = vmul.f32 -2.0, %v97_v51 }
  0x67   :  { %v193_v10 = vor.u32 %v192_v4, %v191_v62  ;;  %v196_v13 = vshll.u32 %v195_v6, 23  ;;  %v289_v12 = vclz %v578_v1  ;;  %v524_v4 = vand.u32 3, %v523_v53 }
  0x68   :  { %v788_v28 = vmul.f32 -2.0, %v99_v21  ;;  %vm104_vm6 = vcmp.eq.f32.partialorder %v779_v22, inf  ;;  %v107_v62 = vand.u32 2147483648, %v779_v22  ;;  %vm106_vm9 = vcmp.eq.f32.partialorder %v779_v22, 0.0 }
  0x69   :  { %v197_v7 = vor.u32 4788187, %v196_v13  ;;  %v200_v9 = vcvt.s32.f32 %v193_v10  ;;  %v579_v54 = vadd.s32 4294967294, %v289_v12 }
  0x6a   :  { %vm111_vm11 = vcmp.eq.f32.partialorder %v788_v28, inf  ;;  %vm113_vm12 = vcmp.eq.f32.partialorder %v788_v28, 0.0  ;;  %v114_v1 = vand.u32 2147483648, %v788_v28 }
  0x6b   :  { %v198_v14 = vand.u32 2147483647, %v197_v7  ;;  %vm580_vm14 = vcmp.lt.s32.totalorder %v579_v54, 0 }
  0x6c   :  { %v292_v18 = vsel %vm580_vm14, 0, %v579_v54  ;;  %vm529_vm14 = vcmp.eq.s32.totalorder %v524_v4, 2 }
  0x6d   :  { %v201_v52 = vmul.f32 %v200_v9, %v198_v14  ;;  %v293_v19 = vsub.s32 32, %v292_v18  ;;  %v294_v20 = vshll.u32 %v285_v0, %v292_v18  ;;  %v297_v5 = vsub.s32 4294967266, %v292_v18 }
  0x6e   :  { %v314_v0 = vand.u32 3, %v310_v47 }
  0x6f   :  { %v202_v17 = vxor.u32 2147483648, %v201_v52  ;;  %v295_v59 = vshrl.u32 %v277_v3, %v293_v19  ;;  %v298_v2 = vadd.s32 127, %v297_v5  ;;  %v539_v19 = vstv %s821_s1  ;;  %s641_s1 = scalar_lea.vmem %s563_s21, 256 }
  0x70   :  { %p642_p5 = scmp.ne.s32.totalorder %s563_s21, %s641_s1  ;;  %p647_p7 = scmp.lt.s32.totalorder %s641_s1, %s641_s1 }
  0x71   :  { %v203_v23 = vsel %vm120_vm13, %v202_v17, %v201_v52  ;;  %v296_v26 = vor.u32 %v295_v59, %v294_v20  ;;  %v299_v27 = vshll.u32 %v298_v2, 23  ;;  %vm319_vm13 = vcmp.eq.s32.totalorder %v314_v0, 2 }
  0x72   :  { %v206_v50 = vsel %vm775_vm15, %v699_v43, %v203_v23  ;;  %vm316_vm15 = vcmp.eq.s32.totalorder %v314_v0, 0  ;;  %p648_p8 = por %p647_p7, %p646_p6 }
  0x73   :  { %609 = vcosq.f32 %v206_v50  ;;  %v300_v30 = vor.u32 4788187, %v299_v27  ;;  %v303_v31 = vcvt.s32.f32 %v296_v26  ;;  %v537_v26 = vld [vmem:[#allocation5] sm:$0xff]  ;;  %v538_v27 = vld [vmem:[#allocation5 + $0x8] sm:$0xff] }
  0x74   :  { %611 = vsinq.f32 %v206_v50  ;;  %p649_p9 = pnand %p648_p8, %p642_p5 }
  0x75   :  { %613 = vrsqrt.f32 %v779_v22  ;;  %v301_v32 = vand.u32 2147483647, %v300_v30 }
  0x76   :  { %615 = vrsqrt.f32 %v788_v28 }
  0x77   :  { %v304_v34 = vmul.f32 %v303_v31, %v301_v32 }
  0x79   :  { %v305_v36 = vxor.u32 2147483648, %v304_v34 }
  0x7b   :  { %v306_v38 = vsel %vm223_vm0, %v305_v36, %v304_v34  ;;  %vm526_vm0 = vcmp.eq.s32.totalorder %v524_v4, 0 }
  0x7c   :  { %v309_v25 = vsel %vm222_vm1, %v701_v44, %v306_v38  ;;  %vm313_vm1 = vweird.f32 %v701_v44 }
  0x7d   :  { %617 = vcosq.f32 %v309_v25 }
  0x7e   :  { %619 = vsinq.f32 %v309_v25 }
  0x80   :  { %v610_v40 = vpop.eup %609 }
  0x81   :  { %v612_v45 = vpop.eup %611  ;;  %v217_v49 = vxor.u32 2147483648, %v610_v40 }
  0x82   :  { %v614_v46 = vpop.eup %613  ;;  %v214_v48 = vxor.u32 2147483648, %v612_v45 }
  0x83   :  { %v103_v11 = vmul.f32 %v614_v46, %v779_v22  ;;  %v616_v55 = vpop.eup %615  ;;  %v218_v57 = vsel %vm216_vm3, %v217_v49, %v612_v45  ;;  %v427_v61 = vsel %vm425_vm5, %v217_v49, %v612_v45  ;;  %vm525_vm3 = vcmp.lt.s32.totalorder %v524_v4, 2 }
  0x84   :  { %v215_v56 = vsel %vm213_vm2, %v610_v40, %v214_v48  ;;  %v424_v58 = vsel %vm422_vm4, %v610_v40, %v214_v48  ;;  %v110_v6 = vmul.f32 %v616_v55, %v788_v28  ;;  %vm315_vm2 = vcmp.lt.s32.totalorder %v314_v0, 2 }
  0x85   :  { %v105_v63 = vsel %vm104_vm6, %v779_v22, %v103_v11  ;;  %v219_v8 = vsel %vm212_vm7, %v215_v56, %v218_v57  ;;  %v428_v10 = vsel %vm421_vm8, %v424_v58, %v427_v61 }
  0x86   :  { %v108_v13 = vsel %vm106_vm9, %v107_v62, %v105_v63  ;;  %v220_v9 = vsel %vm210_vm10, nan, %v219_v8  ;;  %v429_v15 = vsel %vm210_vm10, nan, %v428_v10  ;;  %v112_v14 = vsel %vm111_vm11, %v788_v28, %v110_v6 }
  0x87   :  { %v324_v52 = vmul.f32 %v220_v9, %v108_v13  ;;  %v534_v3 = vmul.f32 %v429_v15, %v108_v13  ;;  %v115_v16 = vsel %vm113_vm12, %v114_v1, %v112_v14 }
  0x89   :  { %v540_v24 = vmul.f32 %v539_v19, %v324_v52  ;;  %v542_v50 = vmul.f32 %v539_v19, %v534_v3 }
  0x8a   :  { %v618_v7 = vpop.eup %617 }
  0x8b   :  { %v620_v12 = vpop.eup %619  ;;  %v320_v54 = vxor.u32 2147483648, %v618_v7 }
  0x8c   :  { %v317_v43 = vxor.u32 2147483648, %v620_v12 }
  0x8d   :  { %v321_v51 = vsel %vm319_vm13, %v320_v54, %v620_v12  ;;  %v531_v60 = vsel %vm529_vm14, %v320_v54, %v620_v12 }
  0x8e   :  { %v318_v17 = vsel %vm316_vm15, %v618_v7, %v317_v43  ;;  %v528_v18 = vsel %vm526_vm0, %v618_v7, %v317_v43 }
  0x8f   :  { %v322_v20 = vsel %vm315_vm2, %v318_v17, %v321_v51  ;;  %v532_v5 = vsel %vm525_vm3, %v528_v18, %v531_v60 }
  0x90   :  { %v323_v21 = vsel %vm313_vm1, nan, %v322_v20  ;;  %v533_v44 = vsel %vm313_vm1, nan, %v532_v5 }
  0x91   :  { %v325_v22 = vmul.f32 %v323_v21, %v115_v16  ;;  %v535_v23 = vmul.f32 %v533_v44, %v115_v16 }
  0x93   :  { %v541_v59 = vmul.f32 %v539_v19, %v325_v22  ;;  %v543_v2 = vmul.f32 %v539_v19, %v535_v23 }
  0x95   :  { %v548_v28 = vcombine.low %v540_v24, %v541_v59  ;;  %v549_v29 = vcombine.low %v542_v50, %v543_v2 }
  0x97   :  { %v552_v30 = vadd.f32 %v548_v28, %v537_v26  ;;  %v553_v31 = vadd.f32 %v549_v29, %v538_v27 }
  0x99   :  { %554 = vst [vmem:[#allocation8] sm:$0xff] %v552_v30  ;;  %555 = vst [vmem:[#allocation8 + $0x8] sm:$0xff] %v553_v31 }
  0x9a   :  { %652 = shalt.err (!%p649_p9)
}
  0x9b   :  { %565 = dma.vmem_to_hbm [thread:$0]  %s563_s21, 256, %s823_s3, [#allocation7]  }
  0x9c   :  { %663 = dma.done.wait [#allocation7], 256  }
  0x9d   :  { %664 = vsyncadd [#allocation7], 4294967040 }
  0x9e   :  { %569 = vsyncpa [#allocation6], 1 }
  0x9f   :  { %570 = vsyncpa [#allocation7], 1 }

</bundles_post_ra>
